<compile_context>
chip_gen: v7x
topology: tpu7x:2x2x1
jax: 0.10.0
libtpu: 0.0.40
codegen_flags: <defaults>
</compile_context>

<pallas_src>
import functools
import math

import jax
import jax.numpy as jnp
from jax.experimental import pallas as pl
from jax.experimental.pallas import tpu as pltpu


def _ln_invariant_kernel(q_ref, qt_ref, x_ref, gam_ref, bet_ref, g_ref, gt_ref,
                         o_ref, *, eps, inv_n, inv_nm1):
    # q_ref/qt_ref : (d, d)        x_ref/o_ref : (d, LC)
    # gam_ref/bet_ref : (1, LC)    g_ref : (LC, TB) one-hot, gt_ref : (TB, LC)
    x = x_ref[...]

    # t = Q^T @ x -- one MXU matmul (Q^T transposed once on the host).
    t = jnp.dot(qt_ref[...], x, preferred_element_type=jnp.float32)        # (d, LC)

    # Per-sample LayerNorm over each (d, m) column group.
    # Factorized group-sum:  (rowvec @ G) collapses each sample's m lanes to a
    # single group total, (… @ G^T) broadcasts it back onto all m lanes.
    g = g_ref[...]                                                          # (LC, TB)
    gt = gt_ref[...]                                                        # (TB, LC)

    colsum = jnp.sum(t, axis=0, keepdims=True)                              # (1, LC)
    gsum = jnp.dot(colsum, g, preferred_element_type=jnp.float32)           # (1, TB)
    mean = jnp.dot(gsum, gt, preferred_element_type=jnp.float32) * inv_n    # (1, LC)

    diff = t - mean                                                         # (d, LC)
    sqsum = jnp.sum(diff * diff, axis=0, keepdims=True)                     # (1, LC)
    gsq = jnp.dot(sqsum, g, preferred_element_type=jnp.float32)             # (1, TB)
    var = jnp.dot(gsq, gt, preferred_element_type=jnp.float32) * inv_nm1    # (1, LC)
    # (Two-pass variance kept on purpose: the E[x^2]-mean^2 single-pass variant
    #  risks cancellation vs. the 1e-4 tolerance.)

    # rsqrt on the EUP; gamma folded into the scale -> one FMA per element.
    scale = jax.lax.rsqrt(var + eps) * gam_ref[...]                         # (1, LC)
    y = diff * scale + bet_ref[...]                                         # (d, LC)

    # Project back: out = Q @ y.
    o_ref[...] = jnp.dot(q_ref[...], y,
                         preferred_element_type=jnp.float32).astype(o_ref.dtype)


@functools.partial(jax.jit, static_argnames=("eps",))
def layernorm_invariant_single(Q, v, gamma, beta, eps=1e-5):
    """Invariant LayerNorm for one irrep key. v: (B, d, m) -> (B, d, m)."""
    B, d, m = v.shape
    n = d * m
    inv_n = 1.0 / float(n)
    # NOTE: deliberate deviation for d*m == 1 (torch's unbiased var is NaN/inf).
    inv_nm1 = 1.0 / float(max(n - 1, 1))

    # ---- lane chunking (all shapes static under jit) ------------------------
    L_real = B * m
    LC_CAP = 1024                    # max lanes per grid step; keeps the
                                     # per-step working set well under the v5e
                                     # 16 MiB scoped default and v7x 64 MiB VMEM
    base = math.lcm(m, 128)          # smallest 128-aligned sample-multiple
    if base > LC_CAP:
        # lcm blow-up guard (e.g. prime m > 128): fall back to sample-aligned
        # chunks; stores may be masked but VMEM stays bounded.
        base = m
    LC = base * max(1, LC_CAP // base)
    if LC >= L_real:
        # Whole batch fits in one chunk.  Split into two 128-aligned chunks
        # when possible so ("parallel",) feeds both v7x TensorCores.
        half_lanes = (-(-B // 2)) * m
        if B > 1 and half_lanes % 128 == 0:
            LC = half_lanes
        else:
            LC = L_real              # single full-extent block (always legal)
    TB = LC // m                     # samples per grid step
    B_pad = -(-B // TB) * TB
    n_chunks = (B_pad * m) // LC

    if B_pad != B:
        # Padded fake samples have var == 0 -> scale = gamma/sqrt(eps); finite
        # garbage is written for those columns and sliced off below.
        v = jnp.pad(v, ((0, B_pad - B), (0, 0), (0, 0)))

    # Pack batch into the lane axis: (B_pad, d, m) -> (d, B_pad*m).
    # allow_input_fusion (below) lets XLA fuse this transpose into the
    # pallas_call input DMA instead of a separate HBM round trip.
    x = jnp.transpose(v, (1, 0, 2)).reshape(d, B_pad * m).astype(jnp.float32)

    gamma = jnp.asarray(gamma, jnp.float32).reshape(m)
    beta = jnp.asarray(beta, jnp.float32).reshape(m)
    g_lane = jnp.tile(gamma, TB).reshape(1, LC)     # per-lane gamma (per sample)
    b_lane = jnp.tile(beta, TB).reshape(1, LC)

    # Factorized group-sum: G[l, s] = 1 iff lane l belongs to sample s.
    grp = jnp.arange(LC, dtype=jnp.int32) // m
    G = (grp[:, None] == jnp.arange(TB, dtype=jnp.int32)[None, :]).astype(jnp.float32)
    GT = G.T                                        # host-side transpose (no XLU)

    Q = jnp.asarray(Q, jnp.float32)
    QT = Q.T                                        # one-time host transpose

    kernel = functools.partial(_ln_invariant_kernel,
                               eps=float(eps), inv_n=inv_n, inv_nm1=inv_nm1)

    # Explicit VMEM limit (double-buffered estimate with headroom), clamped so
    # it is valid on every generation (v5e 16 MiB scoped default, v7x 64 MiB).
    vmem_est = 4 * 2 * (2 * d * LC + 2 * d * d + 2 * LC + 2 * LC * TB)
    vmem_limit = int(min(max(4 * vmem_est, 16 * 2**20), 48 * 2**20))

    out_packed = pl.pallas_call(
        kernel,
        out_shape=jax.ShapeDtypeStruct((d, B_pad * m), jnp.float32),
        grid=(n_chunks,),
        in_specs=[
            pl.BlockSpec((d, d), lambda c: (0, 0)),      # Q     (resident)
            pl.BlockSpec((d, d), lambda c: (0, 0)),      # Q^T   (resident)
            pl.BlockSpec((d, LC), lambda c: (0, c)),     # packed v, lane chunk
            pl.BlockSpec((1, LC), lambda c: (0, 0)),     # gamma lanes (resident)
            pl.BlockSpec((1, LC), lambda c: (0, 0)),     # beta lanes  (resident)
            pl.BlockSpec((LC, TB), lambda c: (0, 0)),    # G     (resident)
            pl.BlockSpec((TB, LC), lambda c: (0, 0)),    # G^T   (resident)
        ],
        out_specs=pl.BlockSpec((d, LC), lambda c: (0, c)),
        compiler_params=pltpu.CompilerParams(
            dimension_semantics=("parallel",),
            vmem_limit_bytes=vmem_limit,
            allow_input_fusion=[False, False, True, False, False, False, False],
        ),
    )(Q, QT, x, g_lane, b_lane, G, GT)

    # Unpack (d, B_pad*m) -> (B_pad, d, m).  Keeping activations in the packed
    # layout across consecutive layers would remove this HBM pass entirely.
    out = out_packed.reshape(d, B_pad, m).transpose(1, 0, 2)
    return out[:B] if B_pad != B else out


class LayerNormInvariant:
    """JAX/Pallas port of the PyTorch LayerNorm_invariant module."""

    def __init__(self, D12_Q, mult):
        self.Q = {k: jnp.asarray(v, dtype=jnp.float32) for k, v in D12_Q.items()}
        self.gamma = {k: jnp.ones((m,), dtype=jnp.float32) for k, m in mult.items()}
        self.beta = {k: jnp.zeros((m,), dtype=jnp.float32) for k, m in mult.items()}

    def __call__(self, D12_vec):
        # One whole-batch pallas_call per irrep key.
        return {
            k: layernorm_invariant_single(self.Q[k], v, self.gamma[k], self.beta[k])
            for k, v in D12_vec.items()
        }


def _reference(Q, v, gamma, beta, eps=1e-5):
    """Pure-JAX reference mirroring the PyTorch forward."""
    t = jnp.einsum("ij,bjm->bim", Q.T, v)
    mean = jnp.mean(t, axis=(-2, -1), keepdims=True)
    n = t.shape[-2] * t.shape[-1]
    var = jnp.sum((t - mean) ** 2, axis=(-2, -1), keepdims=True) / (n - 1)
    t_norm = (t - mean) / jnp.sqrt(var + eps)
    y = t_norm * gamma + beta
    return jnp.einsum("ij,bjm->bim", Q, y)


def _make_orthogonal(key, d):
    a = jax.random.normal(key, (d, d), dtype=jnp.float32)
    q, _ = jnp.linalg.qr(a)
    return q.astype(jnp.float32)


if __name__ == "__main__":
    # Synthetic, deterministic D12_Q (orthogonal per-irrep change-of-basis
    # matrices) and multiplicities.  Small shapes for the demo.
    key = jax.random.PRNGKey(0)
    dims = {"A": 8, "E1": 16, "E2": 16}     # irrep block sizes d_k
    mult = {"A": 4, "E1": 8, "E2": 8}       # multiplicities m_k
    B = 2

    keys = jax.random.split(key, 2 * len(dims) + 1)
    D12_Q = {}
    D12_vec = {}
    for i, (k, d) in enumerate(dims.items()):
        D12_Q[k] = _make_orthogonal(keys[2 * i], d)
        D12_vec[k] = jax.random.normal(keys[2 * i + 1], (B, d, mult[k]),
                                       dtype=jnp.float32)

    module = LayerNormInvariant(D12_Q, mult)
    out = module(D12_vec)
    out = jax.tree_util.tree_map(jax.block_until_ready, out)

    # sanity check against a pure-JAX reference
    for k in dims:
        ref = _reference(D12_Q[k], D12_vec[k], module.gamma[k], module.beta[k])
        assert out[k].shape == ref.shape, f"shape mismatch for {k}"
        assert jnp.allclose(out[k], ref, atol=1e-4, rtol=1e-4), f"mismatch for {k}"

    print("KERNEL_OK")
</pallas_src>

<mosaic_0001>
module attributes {stable_mosaic.version = 11 : i64} {
  func.func @_ln_invariant_kernel(%arg0: i32, %arg1: memref<8x8xf32, #tpu.memory_space<vmem>>, %arg2: memref<8x8xf32, #tpu.memory_space<vmem>>, %arg3: memref<8x8xf32, #tpu.memory_space<vmem>>, %arg4: memref<1x8xf32, #tpu.memory_space<vmem>>, %arg5: memref<1x8xf32, #tpu.memory_space<vmem>>, %arg6: memref<8x2xf32, #tpu.memory_space<vmem>>, %arg7: memref<2x8xf32, #tpu.memory_space<vmem>>, %arg8: memref<8x8xf32, #tpu.memory_space<vmem>>) attributes {dimension_semantics = [#tpu.dimension_semantics<parallel>], iteration_bounds = array<i64: 1>, scalar_prefetch = 0 : i64, scratch_operands = 0 : i64, tpu.core_type = #tpu.core_type<tc>, window_params = [{pipeline_mode = #tpu.pipeline_mode<synchronous>, transform_indices = @transform_0, window_bounds = array<i64: 8, 8>}, {pipeline_mode = #tpu.pipeline_mode<synchronous>, transform_indices = @transform_1, window_bounds = array<i64: 8, 8>}, {transform_indices = @transform_2, window_bounds = array<i64: 8, 8>}, {pipeline_mode = #tpu.pipeline_mode<synchronous>, transform_indices = @transform_3, window_bounds = array<i64: 1, 8>}, {pipeline_mode = #tpu.pipeline_mode<synchronous>, transform_indices = @transform_4, window_bounds = array<i64: 1, 8>}, {pipeline_mode = #tpu.pipeline_mode<synchronous>, transform_indices = @transform_5, window_bounds = array<i64: 8, 2>}, {pipeline_mode = #tpu.pipeline_mode<synchronous>, transform_indices = @transform_6, window_bounds = array<i64: 2, 8>}, {transform_indices = @transform_7, window_bounds = array<i64: 8, 8>}]} {
    %c0 = arith.constant 0 : index
    %c0_0 = arith.constant 0 : index
    %0 = vector.load %arg3[%c0, %c0_0] : memref<8x8xf32, #tpu.memory_space<vmem>>, vector<8x8xf32>
    %c0_1 = arith.constant 0 : index
    %c0_2 = arith.constant 0 : index
    %1 = vector.load %arg2[%c0_1, %c0_2] : memref<8x8xf32, #tpu.memory_space<vmem>>, vector<8x8xf32>
    %cst = arith.constant dense<0.000000e+00> : vector<8x8xf32>
    %2 = tpu.matmul %1, %0, %cst {dimension_numbers = #tpu.dot_dimension_numbers<[1], [0], [0], [1], [0, 0, 1, 1], [], []>} : vector<8x8xf32>, vector<8x8xf32>, vector<8x8xf32> -> vector<8x8xf32>
    %c0_3 = arith.constant 0 : index
    %c0_4 = arith.constant 0 : index
    %3 = vector.load %arg6[%c0_3, %c0_4] : memref<8x2xf32, #tpu.memory_space<vmem>>, vector<8x2xf32>
    %c0_5 = arith.constant 0 : index
    %c0_6 = arith.constant 0 : index
    %4 = vector.load %arg7[%c0_5, %c0_6] : memref<2x8xf32, #tpu.memory_space<vmem>>, vector<2x8xf32>
    %cst_7 = arith.constant dense<0.000000e+00> : vector<8xf32>
    %5 = vector.multi_reduction <add>, %2, %cst_7 [0] : vector<8x8xf32> to vector<8xf32>
    %6 = vector.shape_cast %5 : vector<8xf32> to vector<1x8xf32>
    %cst_8 = arith.constant dense<0.000000e+00> : vector<1x2xf32>
    %7 = tpu.matmul %6, %3, %cst_8 {dimension_numbers = #tpu.dot_dimension_numbers<[1], [0], [0], [1], [0, 0, 1, 1], [], []>} : vector<1x8xf32>, vector<8x2xf32>, vector<1x2xf32> -> vector<1x2xf32>
    %cst_9 = arith.constant dense<0.000000e+00> : vector<1x8xf32>
    %8 = tpu.matmul %7, %4, %cst_9 {dimension_numbers = #tpu.dot_dimension_numbers<[1], [0], [0], [1], [0, 0, 1, 1], [], []>} : vector<1x2xf32>, vector<2x8xf32>, vector<1x8xf32> -> vector<1x8xf32>
    %cst_10 = arith.constant 3.125000e-02 : f32
    %9 = vector.broadcast %cst_10 : f32 to vector<1x8xf32>
    %10 = arith.mulf %8, %9 : vector<1x8xf32>
    %11 = vector.broadcast %10 : vector<1x8xf32> to vector<8x8xf32>
    %12 = arith.subf %2, %11 : vector<8x8xf32>
    %13 = arith.mulf %12, %12 : vector<8x8xf32>
    %cst_11 = arith.constant dense<0.000000e+00> : vector<8xf32>
    %14 = vector.multi_reduction <add>, %13, %cst_11 [0] : vector<8x8xf32> to vector<8xf32>
    %15 = vector.shape_cast %14 : vector<8xf32> to vector<1x8xf32>
    %cst_12 = arith.constant dense<0.000000e+00> : vector<1x2xf32>
    %16 = tpu.matmul %15, %3, %cst_12 {dimension_numbers = #tpu.dot_dimension_numbers<[1], [0], [0], [1], [0, 0, 1, 1], [], []>} : vector<1x8xf32>, vector<8x2xf32>, vector<1x2xf32> -> vector<1x2xf32>
    %cst_13 = arith.constant dense<0.000000e+00> : vector<1x8xf32>
    %17 = tpu.matmul %16, %4, %cst_13 {dimension_numbers = #tpu.dot_dimension_numbers<[1], [0], [0], [1], [0, 0, 1, 1], [], []>} : vector<1x2xf32>, vector<2x8xf32>, vector<1x8xf32> -> vector<1x8xf32>
    %cst_14 = arith.constant 0.0322580636 : f32
    %18 = vector.broadcast %cst_14 : f32 to vector<1x8xf32>
    %19 = arith.mulf %17, %18 : vector<1x8xf32>
    %cst_15 = arith.constant 9.99999974E-6 : f32
    %20 = vector.broadcast %cst_15 : f32 to vector<1x8xf32>
    %21 = arith.addf %19, %20 : vector<1x8xf32>
    %22 = math.rsqrt %21 : vector<1x8xf32>
    %c0_16 = arith.constant 0 : index
    %c0_17 = arith.constant 0 : index
    %23 = vector.load %arg4[%c0_16, %c0_17] : memref<1x8xf32, #tpu.memory_space<vmem>>, vector<1x8xf32>
    %24 = arith.mulf %22, %23 : vector<1x8xf32>
    %25 = vector.broadcast %24 : vector<1x8xf32> to vector<8x8xf32>
    %26 = arith.mulf %12, %25 : vector<8x8xf32>
    %c0_18 = arith.constant 0 : index
    %c0_19 = arith.constant 0 : index
    %27 = vector.load %arg5[%c0_18, %c0_19] : memref<1x8xf32, #tpu.memory_space<vmem>>, vector<1x8xf32>
    %28 = vector.broadcast %27 : vector<1x8xf32> to vector<8x8xf32>
    %29 = arith.addf %26, %28 : vector<8x8xf32>
    %c0_20 = arith.constant 0 : index
    %c0_21 = arith.constant 0 : index
    %30 = vector.load %arg1[%c0_20, %c0_21] : memref<8x8xf32, #tpu.memory_space<vmem>>, vector<8x8xf32>
    %cst_22 = arith.constant dense<0.000000e+00> : vector<8x8xf32>
    %31 = tpu.matmul %30, %29, %cst_22 {dimension_numbers = #tpu.dot_dimension_numbers<[1], [0], [0], [1], [0, 0, 1, 1], [], []>} : vector<8x8xf32>, vector<8x8xf32>, vector<8x8xf32> -> vector<8x8xf32>
    %c0_23 = arith.constant 0 : index
    %c0_24 = arith.constant 0 : index
    %32 = vector.load %arg8[%c0_23, %c0_24] : memref<8x8xf32, #tpu.memory_space<vmem>>, vector<8x8xf32>
    tpu.vector_store %arg8[%c0_23, %c0_24], %31 {strides = array<i32>} : memref<8x8xf32, #tpu.memory_space<vmem>>, vector<8x8xf32>,
    return
  }
  func.func @transform_0(%arg0: i32) -> (i32, i32) {
    %c0_i32 = arith.constant 0 : i32
    %c0_i32_0 = arith.constant 0 : i32
    %c0_i32_1 = arith.constant 0 : i32
    return %c0_i32, %c0_i32_0 : i32, i32
  }
  func.func @transform_1(%arg0: i32) -> (i32, i32) {
    %c0_i32 = arith.constant 0 : i32
    %c0_i32_0 = arith.constant 0 : i32
    %c0_i32_1 = arith.constant 0 : i32
    return %c0_i32, %c0_i32_0 : i32, i32
  }
  func.func @transform_2(%arg0: i32) -> (i32, i32) {
    %c0_i32 = arith.constant 0 : i32
    %c0_i32_0 = arith.constant 0 : i32
    return %c0_i32, %arg0 : i32, i32
  }
  func.func @transform_3(%arg0: i32) -> (i32, i32) {
    %c0_i32 = arith.constant 0 : i32
    %c0_i32_0 = arith.constant 0 : i32
    %c0_i32_1 = arith.constant 0 : i32
    return %c0_i32, %c0_i32_0 : i32, i32
  }
  func.func @transform_4(%arg0: i32) -> (i32, i32) {
    %c0_i32 = arith.constant 0 : i32
    %c0_i32_0 = arith.constant 0 : i32
    %c0_i32_1 = arith.constant 0 : i32
    return %c0_i32, %c0_i32_0 : i32, i32
  }
  func.func @transform_5(%arg0: i32) -> (i32, i32) {
    %c0_i32 = arith.constant 0 : i32
    %c0_i32_0 = arith.constant 0 : i32
    %c0_i32_1 = arith.constant 0 : i32
    return %c0_i32, %c0_i32_0 : i32, i32
  }
  func.func @transform_6(%arg0: i32) -> (i32, i32) {
    %c0_i32 = arith.constant 0 : i32
    %c0_i32_0 = arith.constant 0 : i32
    %c0_i32_1 = arith.constant 0 : i32
    return %c0_i32, %c0_i32_0 : i32, i32
  }
  func.func @transform_7(%arg0: i32) -> (i32, i32) {
    %c0_i32 = arith.constant 0 : i32
    %c0_i32_0 = arith.constant 0 : i32
    return %c0_i32, %arg0 : i32, i32
  }
}

</mosaic_0001>

<bundles_post_ra>
// kernel: tile.14
= control target key start
LH: loop header
LB: loop body
LE: loop exit
PB: predicated region body
PF: predicated region fallthrough
CT: control target
= control target key end

     0   :  { %vm7_vm0 = vcmask 31744   ;;  %vm13_vm1 = vcmask 64544   ;;  %s39_s0 = inlined_call_operand.vmem [shape: f32[2,4], index: 0, kind: input, shape index: {}]   ;;  %s40_s1 = inlined_call_operand.vmem [shape: f32[1,8], index: 1, kind: output, shape index: {}]  }
   0x1   :  { %v4_v0 = vld [vmem:[%s39_s0] sm:$0x3]  ;;  %s22_s0 = smov 4  }
   0x2   :  { %5 = vst [vmem:[#allocation1] sm:$0x3] %v4_v0 }
   0x9   :  { %v10_v1 = vld [vmem:[#allocation1 + $0x1] sm:$0x1]   ;;  %v6_v2 = vld [vmem:[#allocation1] sm:$0x1]  }
   0xa   :  { %11 = vrot.lane.b32.xlu0 %v10_v1, %s22_s0  ;;  %8 = vst.msk [vmem:[#allocation0] sm:$0x1] %vm7_vm0, %v6_v2  }
  0x7c   :  { %v12_v3 = vpop.permute.xlu0 %11  }
  0x7d   :  { %14 = vst.msk [vmem:[#allocation0] sm:$0x1] %vm13_vm1, %v12_v3  }
  0x84   :  { %v18_v4 = vld [vmem:[#allocation0] sm:$0x1] }
  0x85   :  { %20 = vst [vmem:[%s40_s1] sm:$0x1] %v18_v4 }

// kernel: tile.13
= control target key start
LH: loop header
LB: loop body
LE: loop exit
PB: predicated region body
PF: predicated region fallthrough
CT: control target
= control target key end

     0   :  { %s22_s0 = inlined_call_operand.vmem [shape: f32[4], index: 0, kind: input, shape index: {}]   ;;  %s23_s1 = inlined_call_operand.vmem [shape: f32[2,4], index: 1, kind: output, shape index: {}]  }
   0x1   :  { %v4_v0 = vld [vmem:[%s22_s0] ss:$0 sm:$0xff] }
   0x2   :  { %5 = vst [vmem:[%s23_s1] sm:$0x3] %v4_v0 }

// kernel: layernorm_invariant_single.1
= control target key start
LH: loop header
LB: loop body
LE: loop exit
PB: predicated region body
PF: predicated region fallthrough
CT: control target
= control target key end

     0   :  { %vm28_vm0 = vcmask 64512   ;;  %v574_v0 = vmov 0.0   ;;  %vm575_vm1 = vmmov 0   ;;  %vm188_vm2 = vcmask 1041408   ;;  %s655_s2 = inlined_call_operand.vmem [shape: f32[8,8], index: 2, kind: input, shape index: {}]   ;;  %s656_s1 = inlined_call_operand.vmem [shape: f32[8,8], index: 1, kind: input, shape index: {}]   ;;  %s657_s5 = inlined_call_operand.vmem [shape: f32[8,2], index: 5, kind: input, shape index: {}]   ;;  %s658_s6 = inlined_call_operand.vmem [shape: f32[2,8], index: 6, kind: input, shape index: {}]   ;;  %s659_s3 = inlined_call_operand.vmem [shape: f32[1,8], index: 3, kind: input, shape index: {}]   ;;  %s660_s4 = inlined_call_operand.vmem [shape: f32[1,8], index: 4, kind: input, shape index: {}]   ;;  %s661_s0 = inlined_call_operand.vmem [shape: f32[8,8], index: 0, kind: input, shape index: {}]   ;;  %s662_s7 = inlined_call_operand.vmem [shape: f32[8,8], index: 7, kind: output, shape index: {}]  }
   0x1   :  { %540 = vmatprep.subr.mxu0 %v574_v0  ;;  %v26_v1 = vld [vmem:[%s655_s2] sm:$0xff]  ;;  %542 = vmatprep.mubr.msk.f32.mxu0 %vm575_vm1, %v574_v0  ;;  %vm184_vm3 = vcmask 15360   ;;  %v263_v16 = vlaneseq }
   0x2   :  { %v27_v2 = vld [vmem:[%s656_s1] sm:$0xff]  ;;  %541 = vmatpush3.msra.mxu0 %v26_v1  ;;  %545 = vmatprep.subr.mxu1 %v574_v0 }
   0x3   :  { %543 = vmatmul.mubr.msk.f32.vlgmr.msra.gmra.mrb[0].mxu0 %vm28_vm0, %v27_v2  ;;  %547 = vmatprep.mubr.msk.f32.mxu1 %vm575_vm1, %v574_v0  ;;  %v102_v3 = vld [vmem:[%s657_s5] sm:$0xff]  ;;  %v264_v17 = vshrl.u32 %v263_v16, 7 }
   0x4   :  { %550 = vmatprep.subr.mxu0 %v574_v0  ;;  %552 = vmatprep.mubr.msk.f32.mxu0 %vm575_vm1, %v574_v0  ;;  %v103_v13 = vld [vmem:[%s658_s6] sm:$0x3] }
   0x5   :  { %546 = vmatpush3.msra.mxu1 %v102_v3  ;;  %551 = vmatpush3.msk.msra.mxu0 %vm188_vm2, %v103_v13  ;;  %v265_v18 = vsub.s32 0, %v264_v17  ;;  %v425_v38 = vld [vmem:[%s659_s3] sm:$0x1] }
   0x6   :  { %555 = vmatprep.subr.mxu1 %v574_v0  ;;  %560 = vmatprep.subr.mxu0 %v574_v0  ;;  %v526_v42 = vld [vmem:[%s660_s4] ss:$0 sm:$0xff] }
   0x7   :  { %v440_v45 = vld [vmem:[%s661_s0] sm:$0xff] }
  0xd6   :  { %v98_v4 = vpop.f32.mrb[0].mxu0 }
  0xd7   :  { %v104_v5 = vsel %vm28_vm0, %v98_v4, 0.0  ;;  %v544_v6 = vpop.f32.mrb[1].mxu0 }
  0xd8   :  { %v105_v7 = vrot.slane %v104_v5, 4 }
  0xda   :  { %v106_v8 = vadd.f32 %v105_v7, %v104_v5 }
  0xdc   :  { %v107_v9 = vrot.slane %v106_v8, 2 }
  0xde   :  { %v108_v10 = vadd.f32 %v107_v9, %v106_v8 }
  0xe0   :  { %v109_v11 = vrot.slane %v108_v10, 1 }
  0xe2   :  { %v110_v12 = vadd.f32 %v109_v11, %v108_v10 }
  0xe4   :  { %548 = vmatmul.mubr.msk.f32.vlgmr.msra.gmra.mrb[0].mxu1 %vm28_vm0, %v110_v12 }
  0xe5   :  { %556 = vmatpush3.msra.mxu1 %v102_v3  ;;  %557 = vmatprep.mubr.msk.f32.mxu1 %vm575_vm1, %v574_v0 }
  0xe6   :  { %565 = vmatprep.subr.mxu1 %v574_v0 }
 0x1b7   :  { %v180_v14 = vpop.f32.mrb[0].mxu1 }
 0x1b8   :  { %v549_v15 = vpop.f32.mrb[1].mxu1  ;;  %553 = vmatmul.mubr.msk.f32.vlgmr.msra.gmra.mrb[2].mxu0 %vm184_vm3, %v180_v14 }
 0x1b9   :  { %561 = vmatpush3.msk.msra.mxu0 %vm188_vm2, %v103_v13  ;;  %562 = vmatprep.mubr.msk.f32.mxu0 %vm575_vm1, %v574_v0 }
 0x28b   :  { %v258_v19 = vpop.f32.mrb[2].mxu0 }
 0x28c   :  { %v262_v20 = vmul.f32 0.03125, %v258_v19  ;;  %v554_v21 = vpop.f32.mrb[3].mxu0 }
 0x28e   :  { %v266_v22 = vrot.slane %v262_v20, %v265_v18 }
 0x290   :  { %v267_v23 = vsub.f32 %v98_v4, %v266_v22 }
 0x292   :  { %v268_v24 = vmul.f32 %v267_v23, %v267_v23 }
 0x294   :  { %v269_v25 = vsel %vm28_vm0, %v268_v24, 0.0 }
 0x295   :  { %v270_v26 = vrot.slane %v269_v25, 4 }
 0x297   :  { %v271_v27 = vadd.f32 %v270_v26, %v269_v25 }
 0x299   :  { %v272_v28 = vrot.slane %v271_v27, 2 }
 0x29b   :  { %v273_v29 = vadd.f32 %v272_v28, %v271_v27 }
 0x29d   :  { %v274_v30 = vrot.slane %v273_v29, 1 }
 0x29f   :  { %v275_v31 = vadd.f32 %v274_v30, %v273_v29 }
 0x2a1   :  { %558 = vmatmul.mubr.msk.f32.vlgmr.msra.gmra.mrb[2].mxu1 %vm28_vm0, %v275_v31 }
 0x2a2   :  { %567 = vmatprep.mubr.msk.f32.mxu1 %vm575_vm1, %v574_v0 }
 0x374   :  { %v345_v32 = vpop.f32.mrb[2].mxu1 }
 0x375   :  { %v559_v33 = vpop.f32.mrb[3].mxu1  ;;  %563 = vmatmul.mubr.msk.f32.vlgmr.msra.gmra.mrb[4].mxu0 %vm184_vm3, %v345_v32 }
 0x448   :  { %v418_v34 = vpop.f32.mrb[4].mxu0 }
 0x449   :  { %v422_v35 = vmul.f32 0.032258064, %v418_v34  ;;  %v564_v36 = vpop.f32.mrb[5].mxu0 }
 0x44b   :  { %v423_v37 = vadd.f32 1e-05, %v422_v35 }
 0x44d   :  { %572 = vrsqrt.f32 %v423_v37 }
 0x457   :  { %v573_v39 = vpop.eup %572 }
 0x458   :  { %v426_v40 = vmul.f32 %v573_v39, %v425_v38 }
 0x45a   :  { %v430_v41 = vrot.slane %v426_v40, %v265_v18 }
 0x45c   :  { %v431_v43 = vmul.f32 %v430_v41, %v267_v23 }
 0x45e   :  { %v439_v44 = vadd.f32 %v526_v42, %v431_v43 }
 0x460   :  { %566 = vmatpush3.msra.mxu1 %v439_v44 }
 0x461   :  { %568 = vmatmul.mubr.msk.f32.vlgmr.msra.gmra.mrb[4].mxu1 %vm28_vm0, %v440_v45 }
 0x534   :  { %v510_v46 = vpop.f32.mrb[4].mxu1 }
 0x535   :  { %514 = vst.msk [vmem:[%s662_s7] sm:$0xff] %vm28_vm0, %v510_v46  ;;  %v569_v47 = vpop.f32.mrb[5].mxu1 }

</bundles_post_ra>
